<compile_context>
chip_gen: v7x
topology: tpu7x:2x2x1
jax: 0.10.0
libtpu: 0.0.40
codegen_flags: <defaults>
</compile_context>

<pallas_src>
import jax
import jax.numpy as jnp
from jax.experimental import pallas as pl
from jax.experimental.pallas import tpu as pltpu


# ---------------------------------------------------------------------------
# Fused kernel: all conv layers + readout head in one invocation.
# ---------------------------------------------------------------------------
def make_gnn_kernel(num_layers, hidden, fin_pad):
    def kernel(x_ref, adj_ref, ea_ref, p_ref, lp_ref,
               wms_ref, bias_ref, wea_ref, wlp_ref, blp_ref,
               wfus_ref, bfus_ref, wlin_ref, blin_ref,
               emb_ref, out_ref):
        # Layer-invariant structure: loaded once, reused across all layers.
        adj = adj_ref[...]                                   # (N, N)

        # Edge term for ALL layers in one matmul (hoisted out of the loop):
        # (N, F_edge) x (F_edge, L*H) -> (N, L*H), sliced per layer.
        edge_all = jnp.dot(ea_ref[...], wea_ref[...],
                           preferred_element_type=jnp.float32)

        h = x_ref[...]                                       # (N, Fin_pad), zero-padded cols
        for l in range(num_layers):
            if l > 0 and hidden < fin_pad:
                # Only needed when hidden < num_node_features (not in the demo).
                h = jnp.concatenate(
                    [h, jnp.zeros((h.shape[0], fin_pad - hidden), h.dtype)],
                    axis=1)
            # Fused [msg | self] projection: one MXU matmul, 2H output lanes.
            mw = jnp.dot(h, wms_ref[l], preferred_element_type=jnp.float32)
            xw = mw[:, :hidden]                              # h @ W_msg
            slf = mw[:, hidden:]                             # h @ W_self
            agg = jnp.dot(adj, xw, preferred_element_type=jnp.float32)
            # bias_ref[l] == deg*(b_msg+b_edge) + b_self, precomputed (N, H).
            h = jnp.maximum(
                agg + slf + edge_all[:, l * hidden:(l + 1) * hidden]
                + bias_ref[l], 0.0)

        # Readout: mean pool (1/count folded into p_scaled), ligand/pocket
        # block-diagonal linear, fusion linear padded to 128 output lanes,
        # dropout (identity at inference), final padded (128,128) linear.
        pooled = jnp.dot(p_ref[...], h, preferred_element_type=jnp.float32)   # (G, H)
        lp_t = jnp.dot(lp_ref[...], wlp_ref[...],
                       preferred_element_type=jnp.float32) + blp_ref[...]     # (G, 2H)
        wf = wfus_ref[...]                                   # (3H, 128-lane padded)
        fused = (jnp.dot(pooled, wf[:hidden], preferred_element_type=jnp.float32)
                 + jnp.dot(lp_t, wf[hidden:], preferred_element_type=jnp.float32)
                 + bfus_ref[...])                            # (G, 128) lane-dense
        # F.dropout(training=False) == identity.
        emb_ref[...] = fused                                 # lane-dense store
        out_ref[...] = jnp.dot(fused, wlin_ref[...],
                               preferred_element_type=jnp.float32) + blin_ref[...]

    return kernel


# ---------------------------------------------------------------------------
# Wrapper: precompute layer-invariant structure + packed params, run one
# fused pallas_call.
# ---------------------------------------------------------------------------
def gnn_forward(x, edge_index, edge_attr, batch, ligand, pocket,
                convs, head, num_graphs, return_embeddings=False):
    N, f_node = x.shape
    f_edge = edge_attr.shape[1]
    hidden = head["w_lin"].shape[0]
    G = num_graphs
    L = len(convs)
    f_lig, f_poc = ligand.shape[1], pocket.shape[1]
    src, dst = edge_index[0], edge_index[1]

    # --- O(E)/O(N) layer-invariant graph structure (no (E,N) one-hots) -------
    adj = jnp.zeros((N, N), jnp.float32).at[dst, src].add(1.0)            # A @ S
    ea_agg = jnp.zeros((N, f_edge), jnp.float32).at[dst].add(edge_attr)   # A @ edge_attr
    deg = adj.sum(axis=1, keepdims=True)                                  # in-degree (N, 1)
    p_onehot = jnp.zeros((G, N), jnp.float32).at[batch, jnp.arange(N)].set(1.0)
    counts = jnp.maximum(p_onehot.sum(axis=1, keepdims=True), 1.0)
    p_scaled = p_onehot / counts                                          # mean-pool matrix

    # --- packed / padded parameters ------------------------------------------
    fin_pad = max(f_node, hidden)
    x_pad = jnp.zeros((N, fin_pad), jnp.float32).at[:, :f_node].set(x)

    # Stacked [w_msg | w_self] per layer, Fin padded with zero rows.
    wms_list = []
    fin = f_node
    for p in convs:
        w = jnp.zeros((fin_pad, 2 * hidden), jnp.float32)
        w = w.at[:fin, :hidden].set(p["w_msg"])
        w = w.at[:fin, hidden:].set(p["w_self"])
        wms_list.append(w)
        fin = hidden
    w_ms_all = jnp.stack(wms_list)                                        # (L, Fin_pad, 2H)

    # Full per-layer bias constant: deg*(b_msg+b_edge) + b_self  -> (L, N, H).
    bias_all = jnp.stack(
        [deg * (p["b_msg"] + p["b_edge"]) + p["b_self"] for p in convs])

    # Stacked edge weights (F_edge, L*H): one matmul for all layers' edge terms.
    w_edge_all = jnp.concatenate([p["w_edge"] for p in convs], axis=1)

    # Ligand/pocket block-diagonal linear.
    ligpoc = jnp.concatenate([ligand, pocket], axis=1)                    # (G, F_lig+F_poc)
    w_lp = jnp.zeros((f_lig + f_poc, 2 * hidden), jnp.float32)
    w_lp = w_lp.at[:f_lig, :hidden].set(head["w_lig"])
    w_lp = w_lp.at[f_lig:, hidden:].set(head["w_poc"])
    b_lp = jnp.concatenate([head["b_lig"], head["b_poc"]], axis=1)        # (1, 2H)

    # Fusion linear padded to lane-dense 128 output columns.
    emb_lanes = max(128, ((hidden + 127) // 128) * 128)
    w_fus = jnp.concatenate([head["w_fus_g"], head["w_fus_l"], head["w_fus_p"]],
                            axis=0)                                       # (3H, H)
    w_fus_pad = jnp.zeros((3 * hidden, emb_lanes), jnp.float32).at[:, :hidden].set(w_fus)
    b_fus_pad = jnp.zeros((1, emb_lanes), jnp.float32).at[:, :hidden].set(head["b_fus"])

    # Final (hidden, 1) linear padded to a (emb_lanes, 128) lane-dense matmul.
    w_lin_pad = jnp.zeros((emb_lanes, 128), jnp.float32).at[:hidden, :1].set(head["w_lin"])
    b_lin_pad = jnp.zeros((1, 128), jnp.float32).at[:, :1].set(head["b_lin"])

    args = [x_pad, adj, ea_agg, p_scaled, ligpoc,
            w_ms_all, bias_all, w_edge_all, w_lp, b_lp,
            w_fus_pad, b_fus_pad, w_lin_pad, b_lin_pad]

    # --- advisory cost estimate ----------------------------------------------
    flops = 2 * N * f_edge * (L * hidden)                 # hoisted edge matmul
    flops += L * (2 * N * fin_pad * 2 * hidden)           # fused msg|self projections
    flops += L * (2 * N * N * hidden)                     # adj @ xw aggregation
    flops += 2 * G * N * hidden                           # mean pool
    flops += 2 * G * (f_lig + f_poc) * 2 * hidden         # ligand/pocket block-diag
    flops += 2 * G * hidden * emb_lanes + 2 * G * 2 * hidden * emb_lanes  # fusion
    flops += 2 * G * emb_lanes * 128                      # final linear
    bytes_accessed = sum(int(a.size) * a.dtype.itemsize for a in args)
    bytes_accessed += (G * emb_lanes + G * 128) * 4

    kernel = make_gnn_kernel(L, hidden, fin_pad)
    vmem = pl.BlockSpec(memory_space=pltpu.MemorySpace.VMEM)
    emb_pad, out_pad = pl.pallas_call(
        kernel,
        out_shape=(jax.ShapeDtypeStruct((G, emb_lanes), jnp.float32),
                   jax.ShapeDtypeStruct((G, 128), jnp.float32)),
        in_specs=[vmem] * len(args),
        out_specs=(vmem, vmem),
        compiler_params=pltpu.CompilerParams(vmem_limit_bytes=32 * 1024 * 1024),
        cost_estimate=pl.CostEstimate(flops=flops, transcendentals=0,
                                      bytes_accessed=bytes_accessed),
    )(*args)

    if return_embeddings:
        return emb_pad[:, :hidden]
    return out_pad[:, :1]


# ---------------------------------------------------------------------------
# Parameter init (deterministic, synthetic).
# ---------------------------------------------------------------------------
def init_params(key, hidden, num_layers, f_node, f_edge, f_lig, f_poc):
    def lin(k, fin, fout):
        kw, kb = jax.random.split(k)
        w = jax.random.normal(kw, (fin, fout), jnp.float32) * 0.1
        b = jax.random.normal(kb, (1, fout), jnp.float32) * 0.1
        return w, b

    keys = jax.random.split(key, num_layers + 5)
    convs = []
    fin = f_node
    for l in range(num_layers):
        k1, k2, k3 = jax.random.split(keys[l], 3)
        w_msg, b_msg = lin(k1, fin, hidden)
        w_edge, b_edge = lin(k2, f_edge, hidden)
        w_self, b_self = lin(k3, fin, hidden)
        convs.append(dict(w_msg=w_msg, b_msg=b_msg, w_edge=w_edge, b_edge=b_edge,
                          w_self=w_self, b_self=b_self))
        fin = hidden

    w_lig, b_lig = lin(keys[num_layers + 0], f_lig, hidden)
    w_poc, b_poc = lin(keys[num_layers + 1], f_poc, hidden)
    w_fus, b_fus = lin(keys[num_layers + 2], 3 * hidden, hidden)
    w_lin, b_lin = lin(keys[num_layers + 3], hidden, 1)
    head = dict(w_lig=w_lig, b_lig=b_lig, w_poc=w_poc, b_poc=b_poc,
                w_fus_g=w_fus[:hidden], w_fus_l=w_fus[hidden:2 * hidden],
                w_fus_p=w_fus[2 * hidden:], b_fus=b_fus,
                w_lin=w_lin, b_lin=b_lin)
    return convs, head


# ---------------------------------------------------------------------------
# Pure-JAX reference (dense one-hot formulation, same semantics).
# ---------------------------------------------------------------------------
def gnn_forward_ref(x, edge_index, edge_attr, batch, ligand, pocket,
                    convs, head, num_graphs, return_embeddings=False):
    N = x.shape[0]
    src, dst = edge_index[0], edge_index[1]
    S = jax.nn.one_hot(src, N, dtype=jnp.float32)
    A = jax.nn.one_hot(dst, N, dtype=jnp.float32).T
    onehot_b = jax.nn.one_hot(batch, num_graphs, dtype=jnp.float32)
    counts = jnp.maximum(onehot_b.sum(axis=0), 1.0)
    P = (onehot_b / counts[None, :]).T

    h = x
    for p in convs:
        msg = S @ h @ p["w_msg"] + p["b_msg"] + edge_attr @ p["w_edge"] + p["b_edge"]
        h = jnp.maximum(A @ msg + h @ p["w_self"] + p["b_self"], 0.0)
    pooled = P @ h
    lig = ligand @ head["w_lig"] + head["b_lig"]
    poc = pocket @ head["w_poc"] + head["b_poc"]
    fused = (pooled @ head["w_fus_g"] + lig @ head["w_fus_l"]
             + poc @ head["w_fus_p"] + head["b_fus"])
    if return_embeddings:
        return fused
    return fused @ head["w_lin"] + head["b_lin"]


if __name__ == "__main__":
    key = jax.random.PRNGKey(0)

    hidden = 32
    num_layers = 3          # conv1 + 2 extra GeneralConv layers
    f_node, f_edge = 9, 4
    f_lig, f_poc = 10, 6
    num_graphs = 2
    nodes_per_graph = 8
    N = num_graphs * nodes_per_graph

    # Two ring graphs, bidirectional edges -> E = 32.
    src_list, dst_list = [], []
    for g in range(num_graphs):
        base = g * nodes_per_graph
        for i in range(nodes_per_graph):
            j = (i + 1) % nodes_per_graph
            src_list += [base + i, base + j]
            dst_list += [base + j, base + i]
    edge_index = jnp.array([src_list, dst_list], dtype=jnp.int32)   # (2, 32)
    E = edge_index.shape[1]

    k1, k2, k3, k4, kp = jax.random.split(key, 5)
    x = jax.random.normal(k1, (N, f_node), jnp.float32)
    edge_attr = jax.random.normal(k2, (E, f_edge), jnp.float32)
    batch = jnp.repeat(jnp.arange(num_graphs, dtype=jnp.int32), nodes_per_graph)
    ligand = jax.random.normal(k3, (num_graphs, f_lig), jnp.float32)
    pocket = jax.random.normal(k4, (num_graphs, f_poc), jnp.float32)

    convs, head = init_params(kp, hidden, num_layers, f_node, f_edge, f_lig, f_poc)

    out = gnn_forward(x, edge_index, edge_attr, batch, ligand, pocket,
                      convs, head, num_graphs, return_embeddings=False)
    out = jax.block_until_ready(out)
    emb = gnn_forward(x, edge_index, edge_attr, batch, ligand, pocket,
                      convs, head, num_graphs, return_embeddings=True)
    emb = jax.block_until_ready(emb)

    ref = gnn_forward_ref(x, edge_index, edge_attr, batch, ligand, pocket,
                          convs, head, num_graphs, return_embeddings=False)
    ref_emb = gnn_forward_ref(x, edge_index, edge_attr, batch, ligand, pocket,
                              convs, head, num_graphs, return_embeddings=True)

    assert out.shape == (num_graphs, 1)
    assert emb.shape == (num_graphs, hidden)
    assert jnp.allclose(out, ref, atol=1e-4, rtol=1e-4)
    assert jnp.allclose(emb, ref_emb, atol=1e-4, rtol=1e-4)

    print("KERNEL_OK")
</pallas_src>

<mosaic_0001>
module attributes {stable_mosaic.version = 11 : i64} {
  func.func @kernel(%arg0: memref<16x32xf32, #tpu.memory_space<vmem>>, %arg1: memref<16x16xf32, #tpu.memory_space<vmem>>, %arg2: memref<16x4xf32, #tpu.memory_space<vmem>>, %arg3: memref<2x16xf32, #tpu.memory_space<vmem>>, %arg4: memref<2x16xf32, #tpu.memory_space<vmem>>, %arg5: memref<3x32x64xf32, #tpu.memory_space<vmem>>, %arg6: memref<3x16x32xf32, #tpu.memory_space<vmem>>, %arg7: memref<4x96xf32, #tpu.memory_space<vmem>>, %arg8: memref<16x64xf32, #tpu.memory_space<vmem>>, %arg9: memref<1x64xf32, #tpu.memory_space<vmem>>, %arg10: memref<96x128xf32, #tpu.memory_space<vmem>>, %arg11: memref<1x128xf32, #tpu.memory_space<vmem>>, %arg12: memref<128x128xf32, #tpu.memory_space<vmem>>, %arg13: memref<1x128xf32, #tpu.memory_space<vmem>>, %arg14: memref<2x128xf32, #tpu.memory_space<vmem>>, %arg15: memref<2x128xf32, #tpu.memory_space<vmem>>) attributes {dimension_semantics = [], scalar_prefetch = 0 : i64, scratch_operands = 0 : i64, tpu.core_type = #tpu.core_type<tc>} {
    %c0 = arith.constant 0 : index
    %c0_0 = arith.constant 0 : index
    %0 = vector.load %arg1[%c0, %c0_0] : memref<16x16xf32, #tpu.memory_space<vmem>>, vector<16x16xf32>
    %c0_1 = arith.constant 0 : index
    %c0_2 = arith.constant 0 : index
    %1 = vector.load %arg2[%c0_1, %c0_2] : memref<16x4xf32, #tpu.memory_space<vmem>>, vector<16x4xf32>
    %c0_3 = arith.constant 0 : index
    %c0_4 = arith.constant 0 : index
    %2 = vector.load %arg7[%c0_3, %c0_4] : memref<4x96xf32, #tpu.memory_space<vmem>>, vector<4x96xf32>
    %cst = arith.constant dense<0.000000e+00> : vector<16x96xf32>
    %3 = tpu.matmul %1, %2, %cst {dimension_numbers = #tpu.dot_dimension_numbers<[1], [0], [0], [1], [0, 0, 1, 1], [], []>} : vector<16x4xf32>, vector<4x96xf32>, vector<16x96xf32> -> vector<16x96xf32>
    %c0_5 = arith.constant 0 : index
    %c0_6 = arith.constant 0 : index
    %4 = vector.load %arg0[%c0_5, %c0_6] : memref<16x32xf32, #tpu.memory_space<vmem>>, vector<16x32xf32>
    %c0_7 = arith.constant 0 : index
    %c0_8 = arith.constant 0 : index
    %c0_9 = arith.constant 0 : index
    %5 = vector.load %arg5[%c0_7, %c0_8, %c0_9] : memref<3x32x64xf32, #tpu.memory_space<vmem>>, vector<1x32x64xf32>
    %6 = vector.shape_cast %5 : vector<1x32x64xf32> to vector<32x64xf32>
    %cst_10 = arith.constant dense<0.000000e+00> : vector<16x64xf32>
    %7 = tpu.matmul %4, %6, %cst_10 {dimension_numbers = #tpu.dot_dimension_numbers<[1], [0], [0], [1], [0, 0, 1, 1], [], []>} : vector<16x32xf32>, vector<32x64xf32>, vector<16x64xf32> -> vector<16x64xf32>
    %8 = vector.extract_strided_slice %7 {offsets = [0, 0], sizes = [16, 32], strides = [1, 1]} : vector<16x64xf32> to vector<16x32xf32>
    %9 = vector.extract_strided_slice %7 {offsets = [0, 32], sizes = [16, 32], strides = [1, 1]} : vector<16x64xf32> to vector<16x32xf32>
    %cst_11 = arith.constant dense<0.000000e+00> : vector<16x32xf32>
    %10 = tpu.matmul %0, %8, %cst_11 {dimension_numbers = #tpu.dot_dimension_numbers<[1], [0], [0], [1], [0, 0, 1, 1], [], []>} : vector<16x16xf32>, vector<16x32xf32>, vector<16x32xf32> -> vector<16x32xf32>
    %11 = arith.addf %10, %9 : vector<16x32xf32>
    %12 = vector.extract_strided_slice %3 {offsets = [0, 0], sizes = [16, 32], strides = [1, 1]} : vector<16x96xf32> to vector<16x32xf32>
    %13 = arith.addf %11, %12 : vector<16x32xf32>
    %c0_12 = arith.constant 0 : index
    %c0_13 = arith.constant 0 : index
    %c0_14 = arith.constant 0 : index
    %14 = vector.load %arg6[%c0_12, %c0_13, %c0_14] : memref<3x16x32xf32, #tpu.memory_space<vmem>>, vector<1x16x32xf32>
    %15 = vector.shape_cast %14 : vector<1x16x32xf32> to vector<16x32xf32>
    %16 = arith.addf %13, %15 : vector<16x32xf32>
    %cst_15 = arith.constant 0.000000e+00 : f32
    %17 = vector.broadcast %cst_15 : f32 to vector<16x32xf32>
    %18 = arith.maximumf %16, %17 : vector<16x32xf32>
    %c1 = arith.constant 1 : index
    %c0_16 = arith.constant 0 : index
    %c0_17 = arith.constant 0 : index
    %19 = vector.load %arg5[%c1, %c0_16, %c0_17] : memref<3x32x64xf32, #tpu.memory_space<vmem>>, vector<1x32x64xf32>
    %20 = vector.shape_cast %19 : vector<1x32x64xf32> to vector<32x64xf32>
    %cst_18 = arith.constant dense<0.000000e+00> : vector<16x64xf32>
    %21 = tpu.matmul %18, %20, %cst_18 {dimension_numbers = #tpu.dot_dimension_numbers<[1], [0], [0], [1], [0, 0, 1, 1], [], []>} : vector<16x32xf32>, vector<32x64xf32>, vector<16x64xf32> -> vector<16x64xf32>
    %22 = vector.extract_strided_slice %21 {offsets = [0, 0], sizes = [16, 32], strides = [1, 1]} : vector<16x64xf32> to vector<16x32xf32>
    %23 = vector.extract_strided_slice %21 {offsets = [0, 32], sizes = [16, 32], strides = [1, 1]} : vector<16x64xf32> to vector<16x32xf32>
    %cst_19 = arith.constant dense<0.000000e+00> : vector<16x32xf32>
    %24 = tpu.matmul %0, %22, %cst_19 {dimension_numbers = #tpu.dot_dimension_numbers<[1], [0], [0], [1], [0, 0, 1, 1], [], []>} : vector<16x16xf32>, vector<16x32xf32>, vector<16x32xf32> -> vector<16x32xf32>
    %25 = arith.addf %24, %23 : vector<16x32xf32>
    %26 = vector.extract_strided_slice %3 {offsets = [0, 32], sizes = [16, 32], strides = [1, 1]} : vector<16x96xf32> to vector<16x32xf32>
    %27 = arith.addf %25, %26 : vector<16x32xf32>
    %c1_20 = arith.constant 1 : index
    %c0_21 = arith.constant 0 : index
    %c0_22 = arith.constant 0 : index
    %28 = vector.load %arg6[%c1_20, %c0_21, %c0_22] : memref<3x16x32xf32, #tpu.memory_space<vmem>>, vector<1x16x32xf32>
    %29 = vector.shape_cast %28 : vector<1x16x32xf32> to vector<16x32xf32>
    %30 = arith.addf %27, %29 : vector<16x32xf32>
    %cst_23 = arith.constant 0.000000e+00 : f32
    %31 = vector.broadcast %cst_23 : f32 to vector<16x32xf32>
    %32 = arith.maximumf %30, %31 : vector<16x32xf32>
    %c2 = arith.constant 2 : index
    %c0_24 = arith.constant 0 : index
    %c0_25 = arith.constant 0 : index
    %33 = vector.load %arg5[%c2, %c0_24, %c0_25] : memref<3x32x64xf32, #tpu.memory_space<vmem>>, vector<1x32x64xf32>
    %34 = vector.shape_cast %33 : vector<1x32x64xf32> to vector<32x64xf32>
    %cst_26 = arith.constant dense<0.000000e+00> : vector<16x64xf32>
    %35 = tpu.matmul %32, %34, %cst_26 {dimension_numbers = #tpu.dot_dimension_numbers<[1], [0], [0], [1], [0, 0, 1, 1], [], []>} : vector<16x32xf32>, vector<32x64xf32>, vector<16x64xf32> -> vector<16x64xf32>
    %36 = vector.extract_strided_slice %35 {offsets = [0, 0], sizes = [16, 32], strides = [1, 1]} : vector<16x64xf32> to vector<16x32xf32>
    %37 = vector.extract_strided_slice %35 {offsets = [0, 32], sizes = [16, 32], strides = [1, 1]} : vector<16x64xf32> to vector<16x32xf32>
    %cst_27 = arith.constant dense<0.000000e+00> : vector<16x32xf32>
    %38 = tpu.matmul %0, %36, %cst_27 {dimension_numbers = #tpu.dot_dimension_numbers<[1], [0], [0], [1], [0, 0, 1, 1], [], []>} : vector<16x16xf32>, vector<16x32xf32>, vector<16x32xf32> -> vector<16x32xf32>
    %39 = arith.addf %38, %37 : vector<16x32xf32>
    %40 = vector.extract_strided_slice %3 {offsets = [0, 64], sizes = [16, 32], strides = [1, 1]} : vector<16x96xf32> to vector<16x32xf32>
    %41 = arith.addf %39, %40 : vector<16x32xf32>
    %c2_28 = arith.constant 2 : index
    %c0_29 = arith.constant 0 : index
    %c0_30 = arith.constant 0 : index
    %42 = vector.load %arg6[%c2_28, %c0_29, %c0_30] : memref<3x16x32xf32, #tpu.memory_space<vmem>>, vector<1x16x32xf32>
    %43 = vector.shape_cast %42 : vector<1x16x32xf32> to vector<16x32xf32>
    %44 = arith.addf %41, %43 : vector<16x32xf32>
    %cst_31 = arith.constant 0.000000e+00 : f32
    %45 = vector.broadcast %cst_31 : f32 to vector<16x32xf32>
    %46 = arith.maximumf %44, %45 : vector<16x32xf32>
    %c0_32 = arith.constant 0 : index
    %c0_33 = arith.constant 0 : index
    %47 = vector.load %arg3[%c0_32, %c0_33] : memref<2x16xf32, #tpu.memory_space<vmem>>, vector<2x16xf32>
    %cst_34 = arith.constant dense<0.000000e+00> : vector<2x32xf32>
    %48 = tpu.matmul %47, %46, %cst_34 {dimension_numbers = #tpu.dot_dimension_numbers<[1], [0], [0], [1], [0, 0, 1, 1], [], []>} : vector<2x16xf32>, vector<16x32xf32>, vector<2x32xf32> -> vector<2x32xf32>
    %c0_35 = arith.constant 0 : index
    %c0_36 = arith.constant 0 : index
    %49 = vector.load %arg4[%c0_35, %c0_36] : memref<2x16xf32, #tpu.memory_space<vmem>>, vector<2x16xf32>
    %c0_37 = arith.constant 0 : index
    %c0_38 = arith.constant 0 : index
    %50 = vector.load %arg8[%c0_37, %c0_38] : memref<16x64xf32, #tpu.memory_space<vmem>>, vector<16x64xf32>
    %cst_39 = arith.constant dense<0.000000e+00> : vector<2x64xf32>
    %51 = tpu.matmul %49, %50, %cst_39 {dimension_numbers = #tpu.dot_dimension_numbers<[1], [0], [0], [1], [0, 0, 1, 1], [], []>} : vector<2x16xf32>, vector<16x64xf32>, vector<2x64xf32> -> vector<2x64xf32>
    %c0_40 = arith.constant 0 : index
    %c0_41 = arith.constant 0 : index
    %52 = vector.load %arg9[%c0_40, %c0_41] : memref<1x64xf32, #tpu.memory_space<vmem>>, vector<1x64xf32>
    %53 = vector.broadcast %52 : vector<1x64xf32> to vector<2x64xf32>
    %54 = arith.addf %51, %53 : vector<2x64xf32>
    %c0_42 = arith.constant 0 : index
    %c0_43 = arith.constant 0 : index
    %55 = vector.load %arg10[%c0_42, %c0_43] : memref<96x128xf32, #tpu.memory_space<vmem>>, vector<96x128xf32>
    %56 = vector.extract_strided_slice %55 {offsets = [0, 0], sizes = [32, 128], strides = [1, 1]} : vector<96x128xf32> to vector<32x128xf32>
    %cst_44 = arith.constant dense<0.000000e+00> : vector<2x128xf32>
    %57 = tpu.matmul %48, %56, %cst_44 {dimension_numbers = #tpu.dot_dimension_numbers<[1], [0], [0], [1], [0, 0, 1, 1], [], []>} : vector<2x32xf32>, vector<32x128xf32>, vector<2x128xf32> -> vector<2x128xf32>
    %58 = vector.extract_strided_slice %55 {offsets = [32, 0], sizes = [64, 128], strides = [1, 1]} : vector<96x128xf32> to vector<64x128xf32>
    %cst_45 = arith.constant dense<0.000000e+00> : vector<2x128xf32>
    %59 = tpu.matmul %54, %58, %cst_45 {dimension_numbers = #tpu.dot_dimension_numbers<[1], [0], [0], [1], [0, 0, 1, 1], [], []>} : vector<2x64xf32>, vector<64x128xf32>, vector<2x128xf32> -> vector<2x128xf32>
    %60 = arith.addf %57, %59 : vector<2x128xf32>
    %c0_46 = arith.constant 0 : index
    %c0_47 = arith.constant 0 : index
    %61 = vector.load %arg11[%c0_46, %c0_47] : memref<1x128xf32, #tpu.memory_space<vmem>>, vector<1x128xf32>
    %62 = vector.broadcast %61 : vector<1x128xf32> to vector<2x128xf32>
    %63 = arith.addf %60, %62 : vector<2x128xf32>
    %c0_48 = arith.constant 0 : index
    %c0_49 = arith.constant 0 : index
    %64 = vector.load %arg14[%c0_48, %c0_49] : memref<2x128xf32, #tpu.memory_space<vmem>>, vector<2x128xf32>
    tpu.vector_store %arg14[%c0_48, %c0_49], %63 {strides = array<i32>} : memref<2x128xf32, #tpu.memory_space<vmem>>, vector<2x128xf32>,
    %c0_50 = arith.constant 0 : index
    %c0_51 = arith.constant 0 : index
    %65 = vector.load %arg12[%c0_50, %c0_51] : memref<128x128xf32, #tpu.memory_space<vmem>>, vector<128x128xf32>
    %cst_52 = arith.constant dense<0.000000e+00> : vector<2x128xf32>
    %66 = tpu.matmul %63, %65, %cst_52 {dimension_numbers = #tpu.dot_dimension_numbers<[1], [0], [0], [1], [0, 0, 1, 1], [], []>} : vector<2x128xf32>, vector<128x128xf32>, vector<2x128xf32> -> vector<2x128xf32>
    %c0_53 = arith.constant 0 : index
    %c0_54 = arith.constant 0 : index
    %67 = vector.load %arg13[%c0_53, %c0_54] : memref<1x128xf32, #tpu.memory_space<vmem>>, vector<1x128xf32>
    %68 = vector.broadcast %67 : vector<1x128xf32> to vector<2x128xf32>
    %69 = arith.addf %66, %68 : vector<2x128xf32>
    %c0_55 = arith.constant 0 : index
    %c0_56 = arith.constant 0 : index
    %70 = vector.load %arg15[%c0_55, %c0_56] : memref<2x128xf32, #tpu.memory_space<vmem>>, vector<2x128xf32>
    tpu.vector_store %arg15[%c0_55, %c0_56], %69 {strides = array<i32>} : memref<2x128xf32, #tpu.memory_space<vmem>>, vector<2x128xf32>,
    return
  }
}

</mosaic_0001>

<bundles_post_ra>
// kernel: tpu_custom_call.1
= control target key start
LH: loop header
LB: loop body
LE: loop exit
PB: predicated region body
PF: predicated region fallthrough
CT: control target
= control target key end

     0   :  { %21 = vsyncpa [#allocation3], 0  ;;  %s2049_s0 = inlined_call_operand.vmem [shape: f32[16,32], index: 0, kind: input, shape index: {}]   ;;  %s2050_s1 = inlined_call_operand.hbm [shape: f32[16,16], index: 1, kind: input, shape index: {}]   ;;  %s2051_s2 = inlined_call_operand.vmem [shape: f32[16,4], index: 2, kind: input, shape index: {}]   ;;  %s2052_s3 = inlined_call_operand.vmem [shape: f32[2,16], index: 3, kind: input, shape index: {}]   ;;  %s2053_s4 = inlined_call_operand.hbm [shape: f32[2,16], index: 4, kind: input, shape index: {}]   ;;  %s2054_s5 = inlined_call_operand.hbm [shape: f32[3,32,64], index: 5, kind: input, shape index: {}]   ;;  %s2055_s6 = inlined_call_operand.hbm [shape: f32[3,16,32], index: 6, kind: input, shape index: {}]   ;;  %s2056_s7 = inlined_call_operand.vmem [shape: f32[4,96], index: 7, kind: input, shape index: {}]   ;;  %s2057_s8 = inlined_call_operand.vmem [shape: f32[16,64], index: 8, kind: input, shape index: {}]   ;;  %s2058_s9 = inlined_call_operand.vmem [shape: f32[1,64], index: 9, kind: input, shape index: {}]   ;;  %s2059_s10 = inlined_call_operand.hbm [shape: f32[96,128], index: 10, kind: input, shape index: {}]   ;;  %s2060_s11 = inlined_call_operand.vmem [shape: f32[1,128], index: 11, kind: input, shape index: {}]   ;;  %s2061_s12 = inlined_call_operand.hbm [shape: f32[128,128], index: 12, kind: input, shape index: {}]   ;;  %s2062_s13 = inlined_call_operand.vmem [shape: f32[1,128], index: 13, kind: input, shape index: {}]   ;;  %s2063_s14 = inlined_call_operand.hbm [shape: f32[2,128], index: 14, kind: output, shape index: {0}]   ;;  %s2064_s15 = inlined_call_operand.hbm [shape: f32[2,128], index: 15, kind: output, shape index: {1}]  }
   0x1   :  { %22 = vsyncpa [#allocation6], 0 }
   0x2   :  { %23 = vsyncpa [#allocation9], 0 }
   0x3   :  { %24 = vsyncpa [#allocation12], 0 }
   0x4   :  { %25 = vsyncpa [#allocation4], 0 }
   0x5   :  { %26 = vsyncpa [#allocation15], 0  ;;  %s1746_s18 = smov [#allocation5]   ;;  %s1558_s22 = scalar_lea.hbm %s2053_s4, 32 }
   0x6   :  { %s51_s19 = sshll.u32 %s1746_s18, 4  ;;  %p1559_p0 = scmp.ne.s32.totalorder %s2053_s4, %s1558_s22  ;;  %s52_s19 = int_to_ptr.vmem [resolvable:$true] %s51_s19 }
   0x7   :  { %p1562_p1 = scmp.lt.u32.totalorder %s1558_s22, %s2053_s4 }
   0x9   :  { %p1564_p2 = pnand %p1562_p1, %p1559_p0 }
   0xb   :  { %1567 = shalt.err (!%p1564_p2)
}
   0xc   :  { %s1568_s27 = scalar_lea.vmem %s52_s19, 32  ;;  %p1573_p4 = scmp.lt.s32.totalorder %s52_s19, %s52_s19 }
   0xd   :  { %p1569_p3 = scmp.ne.s32.totalorder %s52_s19, %s1568_s27  ;;  %p1574_p5 = scmp.lt.s32.totalorder %s1568_s27, %s1568_s27 }
   0xf   :  { %p1575_p6 = por %p1574_p5, %p1573_p4 }
  0x11   :  { %p1576_p7 = pnand %p1575_p6, %p1569_p3 }
  0x13   :  { %1579 = shalt.err (!%p1576_p7)
}
  0x14   :  { %54 = dma.hbm_to_vmem [thread:$0]  %s2053_s4, 32, %s52_s19, [#allocation6]  }
  0x15   :  { %s1747_s30 = smov [#allocation8]   ;;  %s1748_s17 = smov [#allocation2]  }
  0x16   :  { %s72_s16 = sshll.u32 %s1747_s30, 4  ;;  %s34_s18 = sshll.u32 %s1748_s17, 4  ;;  %s73_s16 = int_to_ptr.vmem [resolvable:$true] %s72_s16  ;;  %s35_s18 = int_to_ptr.vmem [resolvable:$true] %s34_s18 }
  0x17   :  { %s1580_s22 = scalar_lea.hbm %s2055_s6, 768 }
  0x18   :  { %p1581_p8 = scmp.ne.s32.totalorder %s2055_s6, %s1580_s22  ;;  %p1584_p9 = scmp.lt.u32.totalorder %s1580_s22, %s2055_s6 }
  0x1a   :  { %p1586_p10 = pnand %p1584_p9, %p1581_p8 }
  0x1c   :  { %1589 = shalt.err (!%p1586_p10)
}
  0x1d   :  { %s1590_s4 = scalar_lea.vmem %s73_s16, 768  ;;  %p1595_p12 = scmp.lt.s32.totalorder %s73_s16, %s73_s16 }
  0x1e   :  { %p1591_p11 = scmp.ne.s32.totalorder %s73_s16, %s1590_s4  ;;  %p1596_p13 = scmp.lt.s32.totalorder %s1590_s4, %s1590_s4 }
  0x20   :  { %p1597_p0 = por %p1596_p13, %p1595_p12 }
  0x22   :  { %p1598_p1 = pnand %p1597_p0, %p1591_p11 }
  0x24   :  { %1601 = shalt.err (!%p1598_p1)
}
  0x25   :  { %s1749_s19 = smov 128   ;;  %s1750_s27 = smov 8  }
  0x26   :  { %78 = dma.hbm_to_vmem [thread:$0]  %s2055_s6, 768, %s73_s16, [#allocation9], %s1749_s19, %s1749_s19, %s1750_s27  }
  0x27   :  { %s1602_s20 = scalar_lea.hbm %s2050_s1, 256 }
  0x28   :  { %p1603_p2 = scmp.ne.s32.totalorder %s2050_s1, %s1602_s20  ;;  %p1606_p3 = scmp.lt.u32.totalorder %s1602_s20, %s2050_s1 }
  0x2a   :  { %p1608_p4 = pnand %p1606_p3, %p1603_p2 }
  0x2c   :  { %1611 = shalt.err (!%p1608_p4)
}
  0x2d   :  { %s1612_s25 = scalar_lea.vmem %s35_s18, 256  ;;  %p1617_p6 = scmp.lt.s32.totalorder %s35_s18, %s35_s18 }
  0x2e   :  { %p1613_p5 = scmp.ne.s32.totalorder %s35_s18, %s1612_s25  ;;  %p1618_p7 = scmp.lt.s32.totalorder %s1612_s25, %s1612_s25 }
  0x30   :  { %p1619_p8 = por %p1618_p7, %p1617_p6 }
  0x32   :  { %p1620_p9 = pnand %p1619_p8, %p1613_p5 }
  0x34   :  { %1623 = shalt.err (!%p1620_p9)
}
  0x35   :  { %40 = dma.hbm_to_vmem [thread:$0]  %s2050_s1, 256, %s35_s18, [#allocation3], %s1749_s19, %s1749_s19, %s1750_s27  }
  0x36   :  { %s1751_s26 = smov [#allocation7]   ;;  %s1752_s28 = smov [#allocation10]  }
  0x37   :  { %s60_s4 = sshll.u32 %s1751_s26, 4  ;;  %s90_s29 = sshll.u32 %s1752_s28, 4  ;;  %s61_s4 = int_to_ptr.vmem [resolvable:$true] %s60_s4  ;;  %s91_s29 = int_to_ptr.vmem [resolvable:$true] %s90_s29 }
  0x38   :  { %s1624_s20 = scalar_lea.hbm %s2054_s5, 1536 }
  0x39   :  { %p1625_p10 = scmp.ne.s32.totalorder %s2054_s5, %s1624_s20  ;;  %p1628_p11 = scmp.lt.u32.totalorder %s1624_s20, %s2054_s5 }
  0x3b   :  { %p1630_p12 = pnand %p1628_p11, %p1625_p10 }
  0x3d   :  { %1633 = shalt.err (!%p1630_p12)
}
  0x3e   :  { %s1634_s1 = scalar_lea.vmem %s61_s4, 1536  ;;  %p1639_p0 = scmp.lt.s32.totalorder %s61_s4, %s61_s4 }
  0x3f   :  { %p1635_p13 = scmp.ne.s32.totalorder %s61_s4, %s1634_s1  ;;  %p1640_p1 = scmp.lt.s32.totalorder %s1634_s1, %s1634_s1 }
  0x41   :  { %p1641_p2 = por %p1640_p1, %p1639_p0 }
  0x43   :  { %p1642_p3 = pnand %p1641_p2, %p1635_p13 }
  0x45   :  { %1645 = shalt.err (!%p1642_p3)
}
  0x46   :  { %66 = dma.hbm_to_vmem [thread:$0]  %s2054_s5, 1536, %s61_s4, [#allocation6], %s1749_s19, %s1749_s19, %s1750_s27  }
  0x47   :  { %s1646_s26 = scalar_lea.hbm %s2059_s10, 1536 }
  0x48   :  { %p1647_p4 = scmp.ne.s32.totalorder %s2059_s10, %s1646_s26  ;;  %p1650_p5 = scmp.lt.u32.totalorder %s1646_s26, %s2059_s10 }
  0x4a   :  { %p1652_p6 = pnand %p1650_p5, %p1647_p4 }
  0x4c   :  { %1655 = shalt.err (!%p1652_p6)
}
  0x4d   :  { %s1656_s21 = scalar_lea.vmem %s91_s29, 1536  ;;  %p1661_p8 = scmp.lt.s32.totalorder %s91_s29, %s91_s29 }
  0x4e   :  { %p1657_p7 = scmp.ne.s32.totalorder %s91_s29, %s1656_s21  ;;  %p1662_p9 = scmp.lt.s32.totalorder %s1656_s21, %s1656_s21 }
  0x50   :  { %p1663_p10 = por %p1662_p9, %p1661_p8 }
  0x52   :  { %p1664_p11 = pnand %p1663_p10, %p1657_p7 }
  0x54   :  { %1667 = shalt.err (!%p1664_p11)
}
  0x55   :  { %96 = dma.hbm_to_vmem [thread:$0]  %s2059_s10, 1536, %s91_s29, [#allocation9], %s1749_s19, %s1749_s19, %s1750_s27  }
  0x56   :  { %s1753_s22 = smov [#allocation11]   ;;  %s1668_s18 = scalar_lea.hbm %s2061_s12, 2048 }
  0x57   :  { %s104_s23 = sshll.u32 %s1753_s22, 4  ;;  %p1669_p12 = scmp.ne.s32.totalorder %s2061_s12, %s1668_s18  ;;  %s105_s23 = int_to_ptr.vmem [resolvable:$true] %s104_s23 }
  0x58   :  { %p1672_p13 = scmp.lt.u32.totalorder %s1668_s18, %s2061_s12 }
  0x5a   :  { %p1674_p0 = pnand %p1672_p13, %p1669_p12 }
  0x5c   :  { %1677 = shalt.err (!%p1674_p0)
}
  0x5d   :  { %s1678_s28 = scalar_lea.vmem %s105_s23, 2048  ;;  %p1683_p2 = scmp.lt.s32.totalorder %s105_s23, %s105_s23 }
  0x5e   :  { %p1679_p1 = scmp.ne.s32.totalorder %s105_s23, %s1678_s28  ;;  %p1684_p3 = scmp.lt.s32.totalorder %s1678_s28, %s1678_s28 }
  0x60   :  { %p1685_p4 = por %p1684_p3, %p1683_p2 }
  0x62   :  { %p1686_p5 = pnand %p1685_p4, %p1679_p1 }
  0x64   :  { %1689 = shalt.err (!%p1686_p5)
}
  0x65   :  { %110 = dma.hbm_to_vmem [thread:$0]  %s2061_s12, 2048, %s105_s23, [#allocation12], %s1749_s19, %s1749_s19, %s1750_s27  }
  0x66   :  { %1734 = dma.done.wait [#allocation3], 256  }
  0x67   :  { %1735 = vsyncadd [#allocation3], 4294967040 }
  0x68   :  { %1736 = dma.done.wait [#allocation6], 1568  }
  0x69   :  { %1737 = vsyncadd [#allocation6], 4294965728 }
  0x6a   :  { %1738 = dma.done.wait [#allocation9], 2304  }
  0x6b   :  { %1739 = vsyncadd [#allocation9], 4294964992 }
  0x6c   :  { %1740 = dma.done.wait [#allocation12], 2048  }
  0x6d   :  { %1741 = vsyncadd [#allocation12], 4294965248  ;;  %vm143_vm0 = vcmask 1043456   ;;  %vm136_vm1 = vcmask 31744   ;;  %v135_v0 = vld [vmem:[%s2056_s7] sm:$0xf] }
  0x6e   :  { %v133_v1 = vld [vmem:[%s2051_s2] sm:$0xff]  ;;  %v134_v2 = vld [vmem:[%s2051_s2 + $0x8] sm:$0xff]  ;;  %1321 = vmatprep.subr.msk.mxu0 %vm143_vm0, %v135_v0  ;;  %v224_v3 = vld [vmem:[#allocation7] sm:$0xff]  ;;  %vm228_vm2 = vcmask 261120   ;;  %vm318_vm3 = vcmask 130048   ;;  %s1754_s4 = smov 96  }
  0x6f   :  { %1323 = vmatprep.mubr.msk.f32.mxu0 %vm136_vm1, %v133_v1  ;;  %v225_v4 = vld [vmem:[#allocation7 + $0x8] sm:$0xff]  ;;  %v226_v5 = vld [vmem:[#allocation7 + $0x10] sm:$0xff]  ;;  %1322 = vmatpush3.msk.msra.mxu0 %vm143_vm0, %v135_v0  ;;  %v227_v7 = vld [vmem:[#allocation7 + $0x18] sm:$0xff]  ;;  %vm1757_vm4 = vmmov 0   ;;  %vm947_vm5 = vcmask 523264   ;;  %s1759_s16 = smov [#allocation13]  }
  0x70   :  { %v1459_v6 = vpack.c.bf16 %v225_v4, %v224_v3  ;;  %v222_v8 = vld [vmem:[%s2049_s0] sm:$0xff]  ;;  %1324 = vmatmul.mubr.msk.f32.vlgmr.msra.gmra.mrb[0].mxu0 %vm136_vm1, %v134_v2  ;;  %v1463_v9 = vpack.c.bf16 %v227_v7, %v226_v5  ;;  %v223_v10 = vld [vmem:[%s2049_s0 + $0x8] sm:$0xff]  ;;  %v409_v18 = vld [vmem:[#allocation7 + $0x20] sm:$0xff]  ;;  %s1755_s0 = smov 64   ;;  %v1756_v5 = vmov 0.0|0.0   ;;  %s1203_s26 = sshll.u32 %s1759_s16, 4  ;;  %s1204_s26 = int_to_ptr.vmem [resolvable:$true] %s1203_s26 }
  0x71   :  { %1334 = vmatprep.mubr.msk.f32.mxu0 %vm228_vm2, %v222_v8  ;;  %v131_v11 = vld [vmem:[#allocation2] sm:$0xff]  ;;  %v1951_v17 = vld [vmem:[#allocation2 + $0x8] sm:$0xff]  ;;  %v402_v32 = vld [vmem:[#allocation8] sm:$0xff]  ;;  %s1690_s28 = scalar_lea.vmem %s1204_s26, 32  ;;  %p1695_p7 = scmp.lt.s32.totalorder %s1204_s26, %s1204_s26 }
  0x72   :  { %1460 = vmatprep.subr.bf16.mxu0 %v1459_v6  ;;  %v410_v19 = vld [vmem:[#allocation7 + $0x28] sm:$0xff]  ;;  %v411_v21 = vld [vmem:[#allocation7 + $0x30] sm:$0xff]  ;;  %v412_v22 = vld [vmem:[#allocation7 + $0x38] sm:$0xff]  ;;  %p1691_p6 = scmp.ne.s32.totalorder %s1204_s26, %s1690_s28  ;;  %p1696_p8 = scmp.lt.s32.totalorder %s1690_s28, %s1690_s28 }
  0x73   :  { %1462 = vmatpush3.bf16.msra.mxu0 %v1459_v6  ;;  %v1471_v20 = vpack.c.bf16 %v410_v19, %v409_v18  ;;  %v1475_v23 = vpack.c.bf16 %v412_v22, %v411_v21  ;;  %v403_v29 = vld [vmem:[#allocation8 + $0x8] sm:$0xff]  ;;  %v595_v41 = vld [vmem:[#allocation7 + $0x40] sm:$0xff]  ;;  %v597_v44 = vld [vmem:[#allocation7 + $0x50] sm:$0xff]  ;;  %v1758_v6 = vmov 0.0  }
  0x74   :  { %1464 = vmatprep.subr.bf16.mxu0 %v1463_v9  ;;  %v596_v42 = vld [vmem:[#allocation7 + $0x48] sm:$0xff]  ;;  %v598_v45 = vld [vmem:[#allocation7 + $0x58] sm:$0xff]  ;;  %v588_v57 = vld [vmem:[#allocation8 + $0x10] sm:$0xff]  ;;  %p1697_p9 = por %p1696_p8, %p1695_p7 }
  0x75   :  { %v1483_v43 = vpack.c.bf16 %v596_v42, %v595_v41  ;;  %v1487_v46 = vpack.c.bf16 %v598_v45, %v597_v44  ;;  %v589_v53 = vld [vmem:[#allocation8 + $0x18] sm:$0xff]  ;;  %v853_v2 = vld [vmem:[%s2057_s8] sm:$0xff]  ;;  %v945_v41 = vld [vmem:[#allocation10 + $0x50] sm:$0xff] }
  0x76   :  { %v854_v3 = vld [vmem:[%s2057_s8 + $0x8] sm:$0xff]  ;;  %v852_v7 = vld [vmem:[#allocation5] sm:$0x3]  ;;  %v946_v42 = vld [vmem:[#allocation10 + $0x58] sm:$0xff]  ;;  %p1698_p10 = pnand %p1697_p9, %p1691_p6 }
  0x77   :  { %1466 = vmatpush3.bf16.msra.mxu0 %v1463_v9  ;;  %1484 = vmatprep.subr.bf16.mxu1 %v1483_v43  ;;  %v1499_v4 = vpack.c.bf16 %v854_v3, %v853_v2  ;;  %v935_v8 = vld [vmem:[#allocation10] sm:$0xff]  ;;  %v936_v9 = vld [vmem:[#allocation10 + $0x8] sm:$0xff]  ;;  %v1245_v44 = vld [vmem:[%s2058_s9] ss:$0 sm:$0xff] }
  0x78   :  { %1486 = vmatpush3.bf16.msra.mxu1 %v1483_v43  ;;  %v1511_v43 = vpack.c.bf16 %v946_v42, %v945_v41  ;;  %v1114_v2 = vld [vmem:[#allocation11 + $0x58] sm:$0xff] }
  0x79   :  { %1488 = vmatprep.subr.bf16.mxu1 %v1487_v46 }
  0x7a   :  { %1335 = vmatmul.mubr.msk.f32.vlgmr.msra.gmra.mrb[2].mxu0 %vm228_vm2, %v223_v10  ;;  %v1514_v10 = vpack.c.bf16 %v936_v9, %v935_v8  ;;  %v1117_v9 = vld [vmem:[#allocation11 + $0x70] sm:$0xff] }
  0x7b   :  { %1341 = vmatprep.mubr.msk.f32.mxu0 %vm318_vm3, %v131_v11 }
  0x7c   :  { %1490 = vmatpush3.bf16.msra.mxu1 %v1487_v46 }
  0x7d   :  { %1498 = vmatprep.subr.bf16.mxu1 %v1756_v5 }
 0x143   :  { %v1946_v12 = vpop.f32.mrb[0].mxu0 }
 0x144   :  { %v1948_v13 = vpop.f32.mrb[1].mxu0 }
 0x14d   :  { %v1336_v14 = vpop.f32.mrb[2].mxu0 }
 0x14e   :  { %v301_v15 = vpop.f32.mrb[3].mxu0 }
 0x14f   :  { %v1467_v16 = vpack.c.bf16 %v1336_v14, %v301_v15  ;;  %312 = vrot.lane.b32.xlu0 %v301_v15, %s1754_s4 }
 0x151   :  { %1468 = vmatprep.subr.bf16.mxu0 %v1467_v16 }
 0x152   :  { %1470 = vmatpush3.bf16.msra.mxu0 %v1467_v16 }
 0x153   :  { %314 = vrot.lane.b32.xlu0 %v1336_v14, %s1754_s4  ;;  %1472 = vmatprep.subr.bf16.mxu0 %v1471_v20 }
 0x155   :  { %1342 = vmatmul.mubr.msk.f32.vlgmr.msra.gmra.mrb[4].mxu0 %vm318_vm3, %v1951_v17 }
 0x156   :  { %1474 = vmatpush3.bf16.msra.mxu0 %v1471_v20  ;;  %v773_v20 = vld [vmem:[#allocation8 + $0x28] sm:$0xff] }
 0x157   :  { %579 = vrot.lane.b32.xlu0 %v1948_v13, %s1754_s4  ;;  %1476 = vmatprep.subr.bf16.mxu0 %v1475_v23 }
 0x15a   :  { %1478 = vmatpush3.bf16.msra.mxu0 %v1475_v23 }
 0x1c1   :  { %v313_v24 = vpop.permute.xlu0 %312 }
 0x1c5   :  { %v315_v25 = vpop.permute.xlu0 %314 }
 0x1c9   :  { %v580_v55 = vpop.permute.xlu0 %579 }
 0x228   :  { %v1343_v26 = vpop.f32.mrb[4].mxu0 }
 0x229   :  { %v397_v27 = vadd.f32 %v1343_v26, %v315_v25  ;;  %v391_v28 = vpop.f32.mrb[5].mxu0 }
 0x22a   :  { %v392_v30 = vadd.f32 %v391_v28, %v313_v24  ;;  %v772_v24 = vld [vmem:[#allocation8 + $0x20] sm:$0xff] }
 0x22b   :  { %v401_v31 = vadd.f32 %v1946_v12, %v397_v27 }
 0x22c   :  { %v400_v33 = vadd.f32 %v392_v30, %v1948_v13  ;;  %v939_v30 = vld [vmem:[#allocation10 + $0x20] sm:$0xff] }
 0x22d   :  { %v405_v34 = vadd.f32 %v403_v29, %v401_v31  ;;  %v940_v31 = vld [vmem:[#allocation10 + $0x28] sm:$0xff] }
 0x22e   :  { %v404_v35 = vadd.f32 %v402_v32, %v400_v33  ;;  %v778_v33 = vld [vmem:[%s2052_s3] sm:$0x3] }
 0x22f   :  { %v407_v37 = vmax.f32 %v405_v34, 0.0  ;;  %v1502_v34 = vpack.c.bf16 %v940_v31, %v939_v30 }
 0x230   :  { %v406_v36 = vmax.f32 %v404_v35, 0.0  ;;  %v941_v35 = vld [vmem:[#allocation10 + $0x30] sm:$0xff] }
 0x232   :  { %1352 = vmatprep.mubr.msk.f32.mxu0 %vm228_vm2, %v406_v36  ;;  %v942_v36 = vld [vmem:[#allocation10 + $0x38] sm:$0xff] }
 0x233   :  { %1353 = vmatmul.mubr.msk.f32.vlgmr.msra.gmra.mrb[6].mxu0 %vm228_vm2, %v407_v37  ;;  %v1505_v37 = vpack.c.bf16 %v942_v36, %v941_v35 }
 0x234   :  { %1359 = vmatprep.mubr.msk.f32.mxu0 %vm318_vm3, %v131_v11 }
 0x306   :  { %v1354_v38 = vpop.f32.mrb[6].mxu0 }
 0x307   :  { %498 = vrot.lane.b32.xlu1 %v1354_v38, %s1754_s4  ;;  %v485_v39 = vpop.f32.mrb[7].mxu0 }
 0x308   :  { %v1479_v40 = vpack.c.bf16 %v1354_v38, %v485_v39  ;;  %v943_v38 = vld [vmem:[#allocation10 + $0x40] sm:$0xff] }
 0x30a   :  { %1480 = vmatprep.subr.bf16.mxu0 %v1479_v40 }
 0x30b   :  { %496 = vrot.lane.b32.xlu1 %v485_v39, %s1754_s4  ;;  %1482 = vmatpush3.bf16.msra.mxu0 %v1479_v40  ;;  %v944_v39 = vld [vmem:[#allocation10 + $0x48] sm:$0xff] }
 0x30c   :  { %v1508_v40 = vpack.c.bf16 %v944_v39, %v943_v38 }
 0x30e   :  { %1360 = vmatmul.mubr.msk.f32.vlgmr.msra.gmra.mrb[8].mxu0 %vm318_vm3, %v1951_v17 }
 0x30f   :  { %581 = vrot.lane.b32.xlu1 %v1946_v12, %s1754_s4  ;;  %1377 = vmatprep.mubr.msk.f32.mxu0 %vm318_vm3, %v131_v11  ;;  %v937_v11 = vld [vmem:[#allocation10 + $0x10] sm:$0xff] }
 0x379   :  { %v499_v47 = vpop.permute.xlu1 %498 }
 0x37d   :  { %v497_v48 = vpop.permute.xlu1 %496 }
 0x381   :  { %v582_v52 = vpop.permute.xlu1 %581 }
 0x3e1   :  { %v1361_v49 = vpop.f32.mrb[8].mxu0 }
 0x3e2   :  { %v574_v50 = vadd.f32 %v1361_v49, %v499_v47  ;;  %v568_v51 = vpop.f32.mrb[9].mxu0  ;;  %v1104_v49 = vld [vmem:[#allocation11 + $0x8] sm:$0xff] }
 0x3e3   :  { %v569_v54 = vadd.f32 %v568_v51, %v497_v48  ;;  %v1103_v48 = vld [vmem:[#allocation11] sm:$0xff]  ;;  %v1105_v51 = vld [vmem:[#allocation11 + $0x10] sm:$0xff] }
 0x3e4   :  { %v586_v56 = vadd.f32 %v582_v52, %v574_v50  ;;  %v1520_v50 = vpack.c.bf16 %v1104_v49, %v1103_v48  ;;  %v1106_v52 = vld [vmem:[#allocation11 + $0x18] sm:$0xff] }
 0x3e5   :  { %v585_v58 = vadd.f32 %v580_v55, %v569_v54  ;;  %v1523_v55 = vpack.c.bf16 %v1106_v52, %v1105_v51 }
 0x3e6   :  { %v591_v59 = vadd.f32 %v589_v53, %v586_v56  ;;  %v1107_v56 = vld [vmem:[#allocation11 + $0x20] sm:$0xff] }
 0x3e7   :  { %v590_v60 = vadd.f32 %v588_v57, %v585_v58  ;;  %v1108_v57 = vld [vmem:[#allocation11 + $0x28] sm:$0xff] }
 0x3e8   :  { %v593_v62 = vmax.f32 %v591_v59, 0.0  ;;  %v1526_v58 = vpack.c.bf16 %v1108_v57, %v1107_v56  ;;  %v1109_v59 = vld [vmem:[#allocation11 + $0x30] sm:$0xff] }
 0x3e9   :  { %v592_v61 = vmax.f32 %v590_v60, 0.0  ;;  %v1110_v60 = vld [vmem:[#allocation11 + $0x38] sm:$0xff] }
 0x3eb   :  { %1370 = vmatprep.mubr.msk.f32.mxu1 %vm228_vm2, %v592_v61  ;;  %v1529_v61 = vpack.c.bf16 %v1110_v60, %v1109_v59 }
 0x3ec   :  { %1371 = vmatmul.mubr.msk.f32.vlgmr.msra.gmra.mrb[0].mxu1 %vm228_vm2, %v593_v62  ;;  %v1111_v62 = vld [vmem:[#allocation11 + $0x40] sm:$0xff] }
 0x3ed   :  { %1500 = vmatpush3.bf16.msra.mxu1 %v1499_v4  ;;  %1391 = vmatprep.mubr.msk.f32.mxu1 %vm1757_vm4, %v1758_v6  ;;  %v1115_v4 = vld [vmem:[#allocation11 + $0x60] sm:$0xff] }
 0x3ee   :  { %1513 = vmatprep.subr.bf16.mxu1 %v1756_v5 }
 0x3f0   :  { %1392 = vmatmul.mubr.msk.f32.vlgmr.msra.gmra.mrb[2].mxu1 %vm318_vm3, %v852_v7 }
 0x3f1   :  { %1421 = vmatprep.mubr.msk.f32.mxu1 %vm1757_vm4, %v1758_v6  ;;  %1515 = vmatpush3.bf16.msra.mxu1 %v1514_v10  ;;  %v1118_v10 = vld [vmem:[#allocation11 + $0x78] sm:$0xff] }
 0x3f2   :  { %1516 = vmatprep.subr.bf16.mxu1 %v1756_v5 }
 0x4bf   :  { %v1372_v63 = vpop.f32.mrb[0].mxu1 }
 0x4c0   :  { %684 = vrot.lane.b32.xlu1 %v1372_v63, %s1754_s4  ;;  %v671_v0 = vpop.f32.mrb[1].mxu1 }
 0x4c1   :  { %v1491_v1 = vpack.c.bf16 %v1372_v63, %v671_v0  ;;  %682 = vrot.lane.b32.xlu0 %v671_v0, %s1754_s4  ;;  %v1112_v63 = vld [vmem:[#allocation11 + $0x48] sm:$0xff] }
 0x4c2   :  { %v1532_v0 = vpack.c.bf16 %v1112_v63, %v1111_v62 }
 0x4c3   :  { %1492 = vmatprep.subr.bf16.mxu0 %v1491_v1  ;;  %v931_v45 = vpop.f32.mrb[2].mxu1 }
 0x4c4   :  { %765 = vrot.lane.b32.xlu1 %v1946_v12, %s1755_s0  ;;  %1494 = vmatpush3.bf16.msra.mxu0 %v1491_v1  ;;  %v938_v12 = vld [vmem:[#allocation10 + $0x18] sm:$0xff]  ;;  %v932_v46 = vadd.f32 %v1245_v44, %v931_v45  ;;  %v1393_v47 = vpop.f32.mrb[3].mxu1  ;;  %v1113_v1 = vld [vmem:[#allocation11 + $0x50] sm:$0xff] }
 0x4c5   :  { %763 = vrot.lane.b32.xlu0 %v1948_v13, %s1755_s0  ;;  %1495 = vmatprep.subr.bf16.mxu0 %v1756_v5  ;;  %v1517_v13 = vpack.c.bf16 %v938_v12, %v937_v11  ;;  %v1535_v3 = vpack.c.bf16 %v1114_v2, %v1113_v1  ;;  %v1541_v12 = vpack.c.bf16 %v1118_v10, %v1117_v9 }
 0x4c7   :  { %1378 = vmatmul.mubr.msk.f32.vlgmr.msra.gmra.mrb[10].mxu0 %vm318_vm3, %v1951_v17  ;;  %1518 = vmatpush3.bf16.msra.mxu1 %v1517_v13 }
 0x4c8   :  { %1384 = vmatprep.mubr.msk.f32.mxu0 %vm1757_vm4, %v1758_v6  ;;  %1519 = vmatprep.subr.bf16.mxu1 %v1756_v5 }
 0x532   :  { %v685_v14 = vpop.permute.xlu1 %684 }
 0x533   :  { %v683_v15 = vpop.permute.xlu0 %682 }
 0x536   :  { %v766_v19 = vpop.permute.xlu1 %765 }
 0x537   :  { %v764_v22 = vpop.permute.xlu0 %763 }
 0x59a   :  { %v1379_v16 = vpop.f32.mrb[10].mxu0 }
 0x59b   :  { %v760_v17 = vadd.f32 %v1379_v16, %v685_v14  ;;  %v754_v18 = vpop.f32.mrb[11].mxu0  ;;  %v1249_v14 = vld [vmem:[%s2060_s11] ss:$0 sm:$0xff] }
 0x59c   :  { %v755_v21 = vadd.f32 %v754_v18, %v683_v15 }
 0x59d   :  { %v770_v23 = vadd.f32 %v766_v19, %v760_v17 }
 0x59e   :  { %v769_v25 = vadd.f32 %v764_v22, %v755_v21 }
 0x59f   :  { %v775_v26 = vadd.f32 %v773_v20, %v770_v23 }
 0x5a0   :  { %v774_v27 = vadd.f32 %v772_v24, %v769_v25 }
 0x5a1   :  { %v777_v28 = vmax.f32 %v775_v26, 0.0 }
 0x5a2   :  { %v776_v29 = vmax.f32 %v774_v27, 0.0 }
 0x5a4   :  { %v1496_v32 = vpack.c.bf16 %v777_v28, %v776_v29 }
 0x5a6   :  { %1497 = vmatpush3.bf16.msra.mxu0 %v1496_v32 }
 0x5a7   :  { %1501 = vmatprep.subr.bf16.mxu0 %v1756_v5 }
 0x5a9   :  { %1385 = vmatmul.mubr.msk.f32.vlgmr.msra.gmra.mrb[12].mxu0 %vm318_vm3, %v778_v33 }
 0x5aa   :  { %1503 = vmatpush3.bf16.msra.mxu0 %v1502_v34  ;;  %1410 = vmatprep.mubr.msk.f32.mxu0 %vm1757_vm4, %v1758_v6 }
 0x5ab   :  { %1504 = vmatprep.subr.bf16.mxu0 %v1756_v5 }
 0x5ae   :  { %1506 = vmatpush3.bf16.msra.mxu0 %v1505_v37 }
 0x5af   :  { %1507 = vmatprep.subr.bf16.mxu0 %v1756_v5 }
 0x5b2   :  { %1509 = vmatpush3.bf16.msra.mxu0 %v1508_v40 }
 0x5b3   :  { %1510 = vmatprep.subr.bf16.mxu0 %v1756_v5 }
 0x5b6   :  { %1512 = vmatpush3.bf16.msra.mxu0 %v1511_v43 }
 0x5b9   :  { %1411 = vmatmul.mubr.msk.f32.vlgmr.msra.gmra.mrb[14].mxu0 %vm947_vm5, %v932_v46 }
 0x67c   :  { %v848_v53 = vpop.f32.mrb[12].mxu0 }
 0x67d   :  { %v1386_v54 = vpop.f32.mrb[13].mxu0  ;;  %1422 = vmatmul.mubr.msk.f32.vlgmr.msra.gmra.mrb[4].mxu1 %vm228_vm2, %v848_v53 }
 0x67e   :  { %1521 = vmatpush3.bf16.msra.mxu1 %v1520_v50  ;;  %1456 = vmatprep.mubr.msk.f32.mxu1 %vm1757_vm4, %v1758_v6  ;;  %v1116_v6 = vld [vmem:[#allocation11 + $0x68] sm:$0xff] }
 0x67f   :  { %1522 = vmatprep.subr.bf16.mxu1 %v1756_v5  ;;  %v1538_v7 = vpack.c.bf16 %v1116_v6, %v1115_v4 }
 0x682   :  { %1524 = vmatpush3.bf16.msra.mxu1 %v1523_v55 }
 0x683   :  { %1525 = vmatprep.subr.bf16.mxu1 %v1756_v5 }
 0x686   :  { %1527 = vmatpush3.bf16.msra.mxu1 %v1526_v58 }
 0x687   :  { %1528 = vmatprep.subr.bf16.mxu1 %v1756_v5 }
 0x68a   :  { %1530 = vmatpush3.bf16.msra.mxu1 %v1529_v61 }
 0x68b   :  { %1531 = vmatprep.subr.bf16.mxu1 %v1756_v5 }
 0x68c   :  { %v1017_v8 = vpop.f32.mrb[14].mxu0 }
 0x68d   :  { %v1412_v11 = vpop.f32.mrb[15].mxu0 }
 0x68e   :  { %1533 = vmatpush3.bf16.msra.mxu1 %v1532_v0 }
 0x68f   :  { %1534 = vmatprep.subr.bf16.mxu1 %v1756_v5 }
 0x692   :  { %1536 = vmatpush3.bf16.msra.mxu1 %v1535_v3 }
 0x693   :  { %1537 = vmatprep.subr.bf16.mxu1 %v1756_v5 }
 0x696   :  { %1539 = vmatpush3.bf16.msra.mxu1 %v1538_v7 }
 0x697   :  { %1540 = vmatprep.subr.bf16.mxu1 %v1756_v5 }
 0x69a   :  { %1542 = vmatpush3.bf16.msra.mxu1 %v1541_v12 }
 0x750   :  { %v1090_v13 = vpop.f32.mrb[4].mxu1 }
 0x751   :  { %v1091_v15 = vadd.f32 %v1090_v13, %v1017_v8  ;;  %v1423_v16 = vpop.f32.mrb[5].mxu1 }
 0x753   :  { %v1101_v17 = vadd.f32 %v1249_v14, %v1091_v15 }
 0x755   :  { %1102 = vst [vmem:[#allocation13] sm:$0x3] %v1101_v17  ;;  %1457 = vmatmul.mubr.f32.vlgmr.msra.gmra.mrb[6].mxu1 %v1101_v17 }
 0x756   :  { %1701 = shalt.err (!%p1698_p10)
}
 0x757   :  { %s1702_s30 = scalar_lea.hbm %s2063_s14, 32 }
 0x758   :  { %p1703_p11 = scmp.ne.s32.totalorder %s2063_s14, %s1702_s30  ;;  %p1706_p12 = scmp.lt.u32.totalorder %s1702_s30, %s2063_s14 }
 0x75a   :  { %p1708_p13 = pnand %p1706_p12, %p1703_p11 }
 0x75c   :  { %1711 = shalt.err (!%p1708_p13)
}
 0x75d   :  { %1206 = dma.vmem_to_hbm [thread:$0]  %s1204_s26, 32, %s2063_s14, [#allocation4]   ;;  %v1250_v5 = vld [vmem:[%s2062_s13] ss:$0 sm:$0xff] }
 0x75e   :  { %s1760_s2 = smov [#allocation14]  }
 0x75f   :  { %s1213_s7 = sshll.u32 %s1760_s2, 4  ;;  %s1214_s7 = int_to_ptr.vmem [resolvable:$true] %s1213_s7 }
 0x760   :  { %s1712_s4 = scalar_lea.vmem %s1214_s7, 32  ;;  %p1717_p1 = scmp.lt.s32.totalorder %s1214_s7, %s1214_s7 }
 0x761   :  { %p1713_p0 = scmp.ne.s32.totalorder %s1214_s7, %s1712_s4  ;;  %p1718_p2 = scmp.lt.s32.totalorder %s1712_s4, %s1712_s4 }
 0x763   :  { %p1719_p3 = por %p1718_p2, %p1717_p1 }
 0x765   :  { %p1720_p4 = pnand %p1719_p3, %p1713_p0 }
 0x828   :  { %v1192_v18 = vpop.f32.mrb[6].mxu1 }
 0x829   :  { %v1193_v19 = vadd.f32 %v1250_v5, %v1192_v18  ;;  %v1458_v20 = vpop.f32.mrb[7].mxu1 }
 0x82b   :  { %1196 = vst [vmem:[#allocation14] sm:$0x3] %v1193_v19 }
 0x82c   :  { %1723 = shalt.err (!%p1720_p4)
}
 0x82d   :  { %s1724_s22 = scalar_lea.hbm %s2064_s15, 32 }
 0x82e   :  { %p1725_p5 = scmp.ne.s32.totalorder %s2064_s15, %s1724_s22  ;;  %p1728_p6 = scmp.lt.u32.totalorder %s1724_s22, %s2064_s15 }
 0x830   :  { %p1730_p7 = pnand %p1728_p6, %p1725_p5 }
 0x832   :  { %1733 = shalt.err (!%p1730_p7)
}
 0x833   :  { %1216 = dma.vmem_to_hbm [thread:$0]  %s1214_s7, 32, %s2064_s15, [#allocation15]  }
 0x834   :  { %1742 = dma.done.wait [#allocation4], 32  }
 0x835   :  { %1743 = vsyncadd [#allocation4], 4294967264 }
 0x836   :  { %1744 = dma.done.wait [#allocation15], 32  }
 0x837   :  { %1745 = vsyncadd [#allocation15], 4294967264 }
 0x838   :  { %1223 = vsyncpa [#allocation3], 1 }
 0x839   :  { %1224 = vsyncpa [#allocation6], 1 }
 0x83a   :  { %1225 = vsyncpa [#allocation9], 1 }
 0x83b   :  { %1226 = vsyncpa [#allocation12], 1 }
 0x83c   :  { %1227 = vsyncpa [#allocation4], 1 }
 0x83d   :  { %1228 = vsyncpa [#allocation15], 1 }

</bundles_post_ra>
